<compile_context>
chip_gen: v6e
topology: v6e:2x2x1
jax: 0.10.0
libtpu: 0.0.40
codegen_flags: <defaults>
</compile_context>

<pallas_src>
import math

import jax
import jax.numpy as jnp
from jax.experimental import pallas as pl
from jax.experimental.pallas import tpu as pltpu

TANH_COEF = 100.0
MASK_FILL = -100000000.0


def _round_up(x, m):
    return ((x + m - 1) // m) * m


def _sha_kernel(q_ref, k_ref, w_ref, bias_ref, out_ref):
    # q_ref: (TQ, Dp) bf16, k_ref: (Nkp, Dp) bf16, w_ref: (Dp, Dp) bf16,
    # bias_ref: (1, Nkp) f32 additive mask, out_ref: (TQ, Nkp) f32.
    qw = jnp.dot(q_ref[...], w_ref[...], preferred_element_type=jnp.float32)   # (TQ, Dp)
    # (TQ, Dp) x (Nkp, Dp) contracted on Dp -> (TQ, Nkp); no explicit transpose.
    s = jax.lax.dot_general(
        qw.astype(jnp.bfloat16), k_ref[...],
        dimension_numbers=(((1,), (1,)), ((), ())),
        preferred_element_type=jnp.float32,
    )
    u = TANH_COEF * jnp.tanh(s) + bias_ref[...]          # additive mask, bcast over rows
    m = jnp.max(u, axis=-1, keepdims=True)
    shifted = u - m
    lse = jnp.log(jnp.sum(jnp.exp(shifted), axis=-1, keepdims=True))
    out_ref[...] = (shifted - lse).astype(out_ref.dtype)


def single_head_attention(q, k, w_query, w_key, mask=None):
    """q: (B, Nq, D), k: (B, Nk, D), mask: (B, Nk) / (B, 1, Nk) / None.

    Returns log_softmax attention scores, shape (B, Nq, Nk), float32.
    """
    B, Nq, D = q.shape
    _, Nk, _ = k.shape
    norm = 1.0 / math.sqrt(D)

    # Fused projection weight (exact algebraic identity), norm folded in.
    w_fused = norm * jnp.dot(w_query.astype(jnp.float32),
                             w_key.astype(jnp.float32).T)

    # Lane-dense padding: D, Nk -> multiples of 128; Nq tiled in 8-row multiples.
    dp = _round_up(D, 128)
    nkp = _round_up(Nk, 128)
    tq = min(_round_up(Nq, 8), 256)
    nqp = _round_up(Nq, tq)

    q_p = jnp.zeros((B, nqp, dp), jnp.bfloat16).at[:, :Nq, :D].set(q.astype(jnp.bfloat16))
    k_p = jnp.zeros((B, nkp, dp), jnp.bfloat16).at[:, :Nk, :D].set(k.astype(jnp.bfloat16))
    w_p = jnp.zeros((dp, dp), jnp.bfloat16).at[:D, :D].set(w_fused.astype(jnp.bfloat16))

    # Additive mask: 0 where keep, MASK_FILL where masked (incl. padded keys).
    if mask is None:
        keep = jnp.ones((B, Nk), dtype=jnp.float32)
    else:
        keep = (mask.reshape(B, Nk) != 0).astype(jnp.float32)
    bias_row = jnp.where(keep > 0.5, 0.0, MASK_FILL).astype(jnp.float32)
    bias = jnp.full((B, 1, nkp), MASK_FILL, dtype=jnp.float32)
    bias = bias.at[:, 0, :Nk].set(bias_row)

    grid = (B, nqp // tq)

    # Explicit scoped-VMEM budget: double-buffered tiles + headroom, kept well
    # under v7x's tighter 64 MiB physical budget.
    step_bytes = (tq * dp + nkp * dp + dp * dp) * 2 + (nkp + tq * nkp) * 4
    vmem_limit = int(min(max(2 * step_bytes + (8 << 20), 16 << 20), 48 << 20))

    out_p = pl.pallas_call(
        _sha_kernel,
        out_shape=jax.ShapeDtypeStruct((B, nqp, nkp), jnp.float32),
        grid_spec=pltpu.PrefetchScalarGridSpec(
            num_scalar_prefetch=0,
            grid=grid,
            in_specs=[
                pl.BlockSpec((pl.Squeezed(), tq, dp), lambda b, i: (b, i, 0)),    # q tile
                pl.BlockSpec((pl.Squeezed(), nkp, dp), lambda b, i: (b, 0, 0)),   # all keys (per batch)
                pl.BlockSpec((dp, dp), lambda b, i: (0, 0)),                      # fused W
                pl.BlockSpec((pl.Squeezed(), 1, nkp), lambda b, i: (b, 0, 0)),    # additive mask row
            ],
            out_specs=pl.BlockSpec((pl.Squeezed(), tq, nkp), lambda b, i: (b, i, 0)),
        ),
        compiler_params=pltpu.CompilerParams(
            dimension_semantics=("parallel", "parallel"),
            vmem_limit_bytes=vmem_limit,
        ),
    )(q_p, k_p, w_p, bias)

    return out_p[:, :Nq, :Nk]


def init_params(key, embedding_dim):
    """Deterministic uniform(-stdv, stdv) init, matching the PyTorch module."""
    stdv = 1.0 / math.sqrt(embedding_dim)
    kq, kk = jax.random.split(key)
    w_query = jax.random.uniform(kq, (embedding_dim, embedding_dim),
                                 minval=-stdv, maxval=stdv, dtype=jnp.float32)
    w_key = jax.random.uniform(kk, (embedding_dim, embedding_dim),
                               minval=-stdv, maxval=stdv, dtype=jnp.float32)
    return w_query, w_key


if __name__ == "__main__":
    B, Nq, Nk, D = 2, 8, 16, 32

    root = jax.random.PRNGKey(0)
    k_params, k_q, k_k, k_m = jax.random.split(root, 4)

    w_query, w_key = init_params(k_params, D)
    q = jax.random.normal(k_q, (B, Nq, D), dtype=jnp.float32)
    k = jax.random.normal(k_k, (B, Nk, D), dtype=jnp.float32)
    # Mask over keys (1 = keep, 0 = mask out); keep at least the first key valid.
    mask = (jax.random.uniform(k_m, (B, Nk)) > 0.2).astype(jnp.int32)
    mask = mask.at[:, 0].set(1)

    attn = single_head_attention(q, k, w_query, w_key, mask)
    jax.block_until_ready(attn)
    assert attn.shape == (B, Nq, Nk)

    # Pure-JAX reference mirroring the kernel's math (fused W, bf16 MXU feed
    # with f32 accumulation, additive mask). Masked entries differ from the
    # torch masked_fill(-1e8) value only by <= 2*tanh_coef on top of -1e8.
    norm = 1.0 / math.sqrt(D)
    w_f = (norm * (w_query @ w_key.T)).astype(jnp.bfloat16).astype(jnp.float32)
    q_b = q.astype(jnp.bfloat16).astype(jnp.float32)
    k_b = k.astype(jnp.bfloat16).astype(jnp.float32)
    qw = jnp.einsum("bqd,de->bqe", q_b, w_f)
    qw_b = qw.astype(jnp.bfloat16).astype(jnp.float32)
    s = jnp.einsum("bqd,bkd->bqk", qw_b, k_b)
    u = TANH_COEF * jnp.tanh(s) + jnp.where(mask[:, None, :] != 0, 0.0, MASK_FILL)
    ref = jax.nn.log_softmax(u, axis=-1)

    assert jnp.allclose(attn, ref, atol=5e-3, rtol=2e-3), "mismatch vs reference"

    print("KERNEL_OK")
</pallas_src>

<mosaic_0001>
module attributes {stable_mosaic.version = 11 : i64} {
  func.func @_sha_kernel(%arg0: i32, %arg1: i32, %arg2: memref<1x8x128xbf16, #tpu.memory_space<vmem>>, %arg3: memref<1x128x128xbf16, #tpu.memory_space<vmem>>, %arg4: memref<128x128xbf16, #tpu.memory_space<vmem>>, %arg5: memref<1x1x128xf32, #tpu.memory_space<vmem>>, %arg6: memref<1x8x128xf32, #tpu.memory_space<vmem>>) attributes {dimension_semantics = [#tpu.dimension_semantics<parallel>, #tpu.dimension_semantics<parallel>], iteration_bounds = array<i64: 2, 1>, scalar_prefetch = 0 : i64, scratch_operands = 0 : i64, tpu.core_type = #tpu.core_type<tc>, window_params = [{transform_indices = @transform_0, window_bounds = array<i64: 1, 8, 128>}, {transform_indices = @transform_1, window_bounds = array<i64: 1, 128, 128>}, {pipeline_mode = #tpu.pipeline_mode<synchronous>, transform_indices = @transform_2, window_bounds = array<i64: 128, 128>}, {transform_indices = @transform_3, window_bounds = array<i64: 1, 1, 128>}, {transform_indices = @transform_4, window_bounds = array<i64: 1, 8, 128>}]} {
    %c0 = arith.constant 0 : index
    %c0_0 = arith.constant 0 : index
    %c0_1 = arith.constant 0 : index
    %0 = vector.load %arg2[%c0, %c0_0, %c0_1] : memref<1x8x128xbf16, #tpu.memory_space<vmem>>, vector<1x8x128xbf16>
    %1 = vector.shape_cast %0 : vector<1x8x128xbf16> to vector<8x128xbf16>
    %c0_2 = arith.constant 0 : index
    %c0_3 = arith.constant 0 : index
    %2 = vector.load %arg4[%c0_2, %c0_3] : memref<128x128xbf16, #tpu.memory_space<vmem>>, vector<128x128xbf16>
    %cst = arith.constant dense<0.000000e+00> : vector<8x128xf32>
    %3 = tpu.matmul %1, %2, %cst {dimension_numbers = #tpu.dot_dimension_numbers<[1], [0], [0], [1], [0, 0, 1, 1], [], []>} : vector<8x128xbf16>, vector<128x128xbf16>, vector<8x128xf32> -> vector<8x128xf32>
    %4 = arith.truncf %3 : vector<8x128xf32> to vector<8x128xbf16>
    %c0_4 = arith.constant 0 : index
    %c0_5 = arith.constant 0 : index
    %c0_6 = arith.constant 0 : index
    %5 = vector.load %arg3[%c0_4, %c0_5, %c0_6] : memref<1x128x128xbf16, #tpu.memory_space<vmem>>, vector<1x128x128xbf16>
    %6 = vector.shape_cast %5 : vector<1x128x128xbf16> to vector<128x128xbf16>
    %cst_7 = arith.constant dense<0.000000e+00> : vector<8x128xf32>
    %7 = tpu.matmul %4, %6, %cst_7 {dimension_numbers = #tpu.dot_dimension_numbers<[1], [1], [0], [0], [0, 0, 1, 0], [], []>} : vector<8x128xbf16>, vector<128x128xbf16>, vector<8x128xf32> -> vector<8x128xf32>
    %8 = math.tanh %7 : vector<8x128xf32>
    %cst_8 = arith.constant 1.000000e+02 : f32
    %9 = vector.broadcast %cst_8 : f32 to vector<8x128xf32>
    %10 = arith.mulf %9, %8 : vector<8x128xf32>
    %c0_9 = arith.constant 0 : index
    %c0_10 = arith.constant 0 : index
    %c0_11 = arith.constant 0 : index
    %11 = vector.load %arg5[%c0_9, %c0_10, %c0_11] : memref<1x1x128xf32, #tpu.memory_space<vmem>>, vector<1x1x128xf32>
    %12 = vector.shape_cast %11 : vector<1x1x128xf32> to vector<1x128xf32>
    %13 = vector.broadcast %12 : vector<1x128xf32> to vector<8x128xf32>
    %14 = arith.addf %10, %13 : vector<8x128xf32>
    %cst_12 = arith.constant dense<0xFF800000> : vector<8xf32>
    %15 = vector.multi_reduction <maximumf>, %14, %cst_12 [1] : vector<8x128xf32> to vector<8xf32>
    %16 = vector.shape_cast %15 : vector<8xf32> to vector<8x1xf32>
    %17 = vector.broadcast %16 : vector<8x1xf32> to vector<8x128xf32>
    %18 = arith.subf %14, %17 : vector<8x128xf32>
    %19 = math.exp %18 : vector<8x128xf32>
    %cst_13 = arith.constant dense<0.000000e+00> : vector<8xf32>
    %20 = vector.multi_reduction <add>, %19, %cst_13 [1] : vector<8x128xf32> to vector<8xf32>
    %21 = vector.shape_cast %20 : vector<8xf32> to vector<8x1xf32>
    %22 = math.log %21 : vector<8x1xf32>
    %23 = vector.broadcast %22 : vector<8x1xf32> to vector<8x128xf32>
    %24 = arith.subf %18, %23 : vector<8x128xf32>
    %c0_14 = arith.constant 0 : index
    %c0_15 = arith.constant 0 : index
    %c0_16 = arith.constant 0 : index
    %25 = vector.load %arg6[%c0_14, %c0_15, %c0_16] : memref<1x8x128xf32, #tpu.memory_space<vmem>>, vector<1x8x128xf32>
    %26 = vector.shape_cast %25 : vector<1x8x128xf32> to vector<8x128xf32>
    %27 = vector.shape_cast %24 : vector<8x128xf32> to vector<1x8x128xf32>
    tpu.vector_store %arg6[%c0_14, %c0_15, %c0_16], %27 {strides = array<i32>} : memref<1x8x128xf32, #tpu.memory_space<vmem>>, vector<1x8x128xf32>,
    return
  }
  func.func @transform_0(%arg0: i32, %arg1: i32) -> (i32, i32, i32) {
    %c0_i32 = arith.constant 0 : i32
    %c0_i32_0 = arith.constant 0 : i32
    return %arg0, %arg1, %c0_i32 : i32, i32, i32
  }
  func.func @transform_1(%arg0: i32, %arg1: i32) -> (i32, i32, i32) {
    %c0_i32 = arith.constant 0 : i32
    %c0_i32_0 = arith.constant 0 : i32
    %c0_i32_1 = arith.constant 0 : i32
    return %arg0, %c0_i32, %c0_i32_0 : i32, i32, i32
  }
  func.func @transform_2(%arg0: i32, %arg1: i32) -> (i32, i32) {
    %c0_i32 = arith.constant 0 : i32
    %c0_i32_0 = arith.constant 0 : i32
    %c0_i32_1 = arith.constant 0 : i32
    return %c0_i32, %c0_i32_0 : i32, i32
  }
  func.func @transform_3(%arg0: i32, %arg1: i32) -> (i32, i32, i32) {
    %c0_i32 = arith.constant 0 : i32
    %c0_i32_0 = arith.constant 0 : i32
    %c0_i32_1 = arith.constant 0 : i32
    return %arg0, %c0_i32, %c0_i32_0 : i32, i32, i32
  }
  func.func @transform_4(%arg0: i32, %arg1: i32) -> (i32, i32, i32) {
    %c0_i32 = arith.constant 0 : i32
    %c0_i32_0 = arith.constant 0 : i32
    return %arg0, %arg1, %c0_i32 : i32, i32, i32
  }
}

</mosaic_0001>

<bundles_post_ra>
// kernel: tpu_custom_call.1
= control target key start
LH: loop header
LB: loop body
LE: loop exit
PB: predicated region body
PF: predicated region fallthrough
CT: control target
= control target key end

     0   :  { %s1277_s0 = inlined_call_operand.hbm [shape: bf16[2,8,128], index: 0, kind: input, shape index: {}]   ;;  %s1278_s1 = inlined_call_operand.hbm [shape: bf16[2,128,128], index: 1, kind: input, shape index: {}]   ;;  %s1279_s2 = inlined_call_operand.hbm [shape: bf16[128,128], index: 2, kind: input, shape index: {}]   ;;  %s1280_s3 = inlined_call_operand.vmem [shape: f32[2,1,128], index: 3, kind: input, shape index: {}]   ;;  %s1281_s4 = inlined_call_operand.hbm [shape: f32[2,8,128], index: 4, kind: output, shape index: {}]  }
   0x1   :  { %1286 = sst [smem:[#allocation15_spill]] %s1277_s0 }
   0x2   :  { %1287 = sst [smem:[#allocation16_spill]] %s1279_s2 }
   0x3   :  { %9 = vsyncpa [#allocation3], 0 }
   0x4   :  { %11 = vsyncpa [#allocation3 + $0x1], 0 }
   0x5   :  { %12 = vsyncpa [#allocation6], 0 }
   0x6   :  { %14 = vsyncpa [#allocation6 + $0x1], 0 }
   0x7   :  { %15 = vsyncpa [#allocation4], 0 }
   0x8   :  { %17 = vsyncpa [#allocation4 + $0x1], 0  ;;  %s1070_s15 = smov 0   ;;  %s1072_s16 = smov 0  }
   0x9   :  { %s1074_s17 = smov 0   ;;  %s1076_s18 = smov 0  }
   0xa   :  { %s1078_s19 = smov 0   ;;  %s1080_s20 = smov 0  }
   0xb LB: > { %1288 = sst [smem:[#allocation13_spill]] %s1031_s19  ;;  %s1101_s21 = sadd.s32 4294967295, %s1035_s20   ;;  %s1035_s20 = sphi %s1080_s20, %s23_s20   ;;  %s1031_s19 = sphi %s1078_s19, %s1304_s19   ;;  %s1027_s18 = sphi %s1076_s18, %s1303_s18   ;;  %s1023_s17 = sphi %s1074_s17, %s1307_s17   ;;  %s1019_s16 = sphi %s1072_s16, %s1306_s16   ;;  %s1015_s15 = sphi %s1070_s15, %s1305_s15  }
   0xc   : > { %s667_s22 = sadd.s32 4294967294, %s1035_s20   ;;  %p57_p0 = scmp.ne.s32.totalorder %s1019_s16, %s1015_s15 }
   0xd   : > { %p58_p1 = scmp.eq.s32.totalorder %s1101_s21, 0  ;;  %p162_p3 = scmp.eq.s32.totalorder %s667_s22, 1 }
   0xe   : > { %p668_p5 = scmp.ge.s32.totalorder %s1035_s20, 1  ;;  %p169_p7 = scmp.lt.s32.totalorder %s1035_s20, 3 }
   0xf   : > { %p1110_p4 = por %p58_p1, %p57_p0  ;;  %p1115_p6 = por %p162_p3, %p57_p0 }
  0x10   : > { %p1120_p8 = pnand %p668_p5, %p169_p7  ;;  %s1037_s26 = smov [#allocation7]  }
  0x11   : > { %s1290_s24 = scalar_select %p1115_p6, 1, 0 }
  0x12   : > { %s181_s27 = sshll.u32 %s1037_s26, 4  ;;  %p771_p9 = pneg %p1120_p8  ;;  %s182_s27 = int_to_ptr.vmem [resolvable:$true] %s181_s27 }
  0x13   : > { %p670_p10 = scmp.ge.s32.totalorder %s1035_s20, 2  ;;  %s35_s29 = sadd.s32 1, %s1031_s19 }
  0x14   : > { %p1129_p11 = pnand %p771_p9, %p58_p1  ;;  %s876_s30 = scalar_lea.vmem %s182_s27, 1024 }
  0x15   : > { %p877_p13 = scmp.ne.s32.totalorder %s182_s27, %s876_s30  ;;  %p884_p5 = scmp.lt.s32.totalorder %s182_s27, %s182_s27 }
  0x16   : > { %p867_p12 = pneg %p1129_p11  ;;  %p885_p7 = scmp.lt.s32.totalorder %s876_s30, %s876_s30 }
  0x18   : > { %p879_p0 = pnand %p877_p13, %p867_p12  ;;  %p886_p2 = por %p885_p7, %p884_p5 }
  0x1a   : > { %p880_p3 = pneg %p879_p0 }
  0x1c   : > { %p887_p6 = pnand %p886_p2, %p880_p3 }
  0x1e   : > { %890 = shalt.err (!%p887_p6)
}
  0x1f   : > { %s1282_s5 = smov 64   ;;  %s1283_s6 = smov 4  }
  0x20   : > { %s1293_s2 = sld [smem:[#allocation16_spill]]  ;;  %p37_p2 = scmp.ge.s32.totalorder %s35_s29, 2 }
  0x21   : > { %s44_s9 = sadd.s32 1, %s1023_s17  ;;  %p51_p6 = scmp.ne.s32.totalorder %s1023_s17, %s1019_s16 }
  0x22   : > { %p52_p9 = scmp.eq.s32.totalorder %s1035_s20, 0  ;;  %s1309_s29 = smov (%p37_p2, %s35_s29), 0 }
  0x23   : > { %1294 = sst [smem:[#allocation14_spill]] %s1309_s29  ;;  %p1296_p13 = scmp.eq.s32.totalorder %s1101_s21, 1 }
  0x24   : > { %p1150_p12 = por %p52_p9, %p51_p6  ;;  %s39_s12 = ssub.s32 %s1031_s19, %s1309_s29 }
  0x25   : > { %p1156_p0 = por %p1296_p13, %p51_p6  ;;  %p42_p3 = scmp.eq.s32.totalorder %s39_s12, 0 }
  0x26   : > { %774 = dma.hbm_to_vmem [thread:$0]  (!%p1129_p11), %s1293_s2, 1024, %s182_s27, [#allocation6], %s1282_s5, %s1282_s5, %s1283_s6  }
  0x27   : > { %p787_p11 = scmp.lt.s32.totalorder %s1035_s20, 2  ;;  %s195_s13 = sand.u32 1, %s1023_s17  }
  0x28   : > { %s671_s14 = sshll.u32 %s195_s13, 2  ;;  %s672_s26 = sshll.u32 %s1031_s19, 6 }
  0x29   : > { %s1165_s22 = scalar_select %p42_p3, %s1023_s17, %s44_s9  }
  0x2a   : > { %s1298_s0 = sld [smem:[#allocation15_spill]]  ;;  %s199_s7 = scalar_lea.vmem [#allocation2], %s671_s14 }
  0x2b   : > { %s207_s8 = sshll.u32 %s199_s7, 4  ;;  %p1173_p5 = pnand %p787_p11, %p1150_p12  ;;  %s208_s8 = int_to_ptr.vmem [resolvable:$true] %s207_s8 }
  0x2c   : > { %s673_s12 = sshll.u32 %s195_s13, 6  ;;  %s702_s6 = sshll.u32 %s1031_s19, 10 }
  0x2d   : > { %s196_s2 = scalar_lea.sflag [#allocation3], %s195_s13  ;;  %p893_p7 = pneg %p1173_p5 }
  0x2e   : > { %s904_s9 = scalar_lea.vmem %s208_s8, 64  ;;  %s1040_s14 = smov [#allocation2]  }
  0x2f   : > { %p905_p2 = scmp.ne.s32.totalorder %s208_s8, %s904_s9 }
  0x30   : > { %s205_s30 = scalar_lea.hbm %s1298_s0, %s672_s26  ;;  %s909_s26 = sshll.u32 %s1040_s14, 4  ;;  %s910_s26 = int_to_ptr.vmem [resolvable:$false] %s909_s26 }
  0x31   : > { %p907_p6 = pnand %p905_p2, %p893_p7  ;;  %s911_s10 = scalar_lea.vmem %s910_s26, 128 }
  0x32   : > { %p912_p12 = scmp.lt.s32.totalorder %s208_s8, %s910_s26  ;;  %p913_p13 = scmp.lt.s32.totalorder %s911_s10, %s904_s9 }
  0x33   : > { %p908_p9 = pneg %p907_p6 }
  0x34   : > { %p914_p11 = por %p913_p13, %p912_p12 }
  0x36   : > { %p915_p3 = pnand %p914_p11, %p908_p9 }
  0x38   : > { %918 = shalt.err (!%p915_p3)
}
  0x39   : > { %778 = dma.hbm_to_vmem [thread:$0]  (!%p1173_p5), %s205_s30, 64, %s208_s8, %s196_s2  }
  0x3a   : > { %s218_s13 = scalar_lea.vmem [#allocation5], %s673_s12  ;;  %s214_s28 = sand.u32 1, %s1035_s20  }
  0x3b   : > { %s225_s27 = sshll.u32 %s218_s13, 4  ;;  %s224_s14 = scalar_lea.hbm %s1278_s1, %s702_s6  ;;  %s226_s27 = int_to_ptr.vmem [resolvable:$true] %s225_s27 }
  0x3c   : > { %s215_s29 = scalar_lea.sflag [#allocation6], %s214_s28  ;;  %s932_s19 = scalar_lea.vmem %s226_s27, 1024 }
  0x3d   : > { %p933_p2 = scmp.ne.s32.totalorder %s226_s27, %s932_s19  ;;  %s1041_s9 = smov [#allocation5]  }
  0x3e   : > { %s937_s26 = sshll.u32 %s1041_s9, 4  ;;  %s938_s26 = int_to_ptr.vmem [resolvable:$false] %s937_s26 }
  0x3f   : > { %p935_p6 = pnand %p933_p2, %p893_p7  ;;  %s939_s10 = scalar_lea.vmem %s938_s26, 2048 }
  0x40   : > { %p940_p12 = scmp.lt.s32.totalorder %s226_s27, %s938_s26  ;;  %p941_p13 = scmp.lt.s32.totalorder %s939_s10, %s932_s19 }
  0x41   : > { %p936_p9 = pneg %p935_p6 }
  0x42   : > { %p942_p11 = por %p941_p13, %p940_p12 }
  0x44   : > { %p943_p3 = pnand %p942_p11, %p936_p9 }
  0x46   : > { %946 = shalt.err (!%p943_p3)
}
  0x47   : > { %s1300_s0 = smov 4   ;;  %s1301_s2 = smov 64  }
  0x48   : > { %781 = dma.hbm_to_vmem [thread:$0]  (!%p1173_p5), %s224_s14, 1024, %s226_s27, %s215_s29, %s1301_s2, %s1301_s2, %s1300_s0  }
  0x49   : > { %243 = sbr.rel (%p1120_p8) target bundleno = 849 (0x351), region = 36  ;;  %s1200_s6 = sand.u32 (!%p1120_p8), 1, %s1019_s16  }
  0x4a   : > { %s677_s30 = sshll.u32 (!%p1120_p8), %s1200_s6, 2  ;;  %s246_s19 = scalar_lea.sflag (!%p1120_p8), [#allocation3], %s1200_s6 }
  0x4b   : > { %s1204_s8 = scalar_lea.vmem (!%p1120_p8), [#allocation2], %s677_s30 }
  0x4e   : > { %998 = dma.done.wait (%p1110_p4), %s246_s19, 64  }
  0x4f   : > { %1000 = vsyncadd (%p1110_p4), %s246_s19, 4294967232  ;;  %s254_s25 = sand.u32 1, %s1101_s21   ;;  %s678_s29 = sshll.u32 %s1200_s6, 6 }
  0x50   : > { %s255_s5 = scalar_lea.sflag [#allocation6], %s254_s25  ;;  %s1212_s12 = scalar_lea.vmem [#allocation5], %s678_s29 }
  0x51   : > { %1002 = dma.done.wait (%p1110_p4), %s255_s5, 1024  }
  0x52   : > { %1004 = vsyncadd (%p1110_p4), %s255_s5, 4294966272 }
  0x53   : > { %1006 = dma.done.wait (%p58_p1), [#allocation6], 1024  }
  0x54   : > { %1008 = vsyncadd (%p58_p1), [#allocation6], 4294966272  ;;  %v1042_v0 = vmov 0.0   ;;  %vm1043_vm0 = vmmov 0   ;;  %v843_v1 = vld [vmem:[#allocation7 + $0x38] sm:$0xff]   ;;  %v844_v2 = vld [vmem:[#allocation7 + $0x30] sm:$0xff]  }
  0x55   : > { %721 = vmatprep.subr.bf16.mxu0 %v1042_v0  ;;  %737 = vmatprep.mubr.msk.bf16.mxu0 %vm1043_vm0, %v1042_v0  ;;  %v845_v3 = vld [vmem:[#allocation7 + $0x28] sm:$0xff]   ;;  %v851_v4 = vld [vmem:[%s1212_s12 + $0x38] sm:$0xff]   ;;  %v846_v5 = vld [vmem:[#allocation7 + $0x20] sm:$0xff]   ;;  %p295_p1 = scmp.lt.s32.totalorder %s1027_s18, 1  ;;  %s680_s28 = sshll.u32 %s1200_s6, 3 }
  0x56   : > { %741 = vmatprep.subr.bf16.mxu1 %v1042_v0  ;;  %757 = vmatprep.mubr.msk.bf16.mxu1 %vm1043_vm0, %v1042_v0  ;;  %v847_v6 = vld [vmem:[#allocation7 + $0x18] sm:$0xff]   ;;  %v852_v7 = vld [vmem:[%s1212_s12 + $0x30] sm:$0xff]   ;;  %v849_v9 = vld [vmem:[#allocation7 + $0x8] sm:$0xff]   ;;  %s699_s7 = sshll.u32 %s1027_s18, 7  ;;  %s294_s14 = scalar_lea.vmem [#allocation8], %s680_s28 }
  0x57   : > { %722 = vmatpush3.bf16.msra.mxu0 %v843_v1  ;;  %742 = vmatpush3.bf16.xpose.msra.mxu1 %v851_v4  ;;  %v848_v8 = vld [vmem:[#allocation7 + $0x10] sm:$0xff]   ;;  %v853_v10 = vld [vmem:[%s1212_s12 + $0x28] sm:$0xff]   ;;  %v850_v11 = vld [vmem:[#allocation7] sm:$0xff]   ;;  %s296_s21 = scalar_select %p295_p1, %s1027_s18, 1 }
  0x58   : > { %723 = vmatprep.subr.bf16.mxu0 %v1042_v0  ;;  %743 = vmatprep.subr.bf16.mxu1 %v1042_v0  ;;  %v299_v12 = vld [vmem:[%s1204_s8] sm:$0xf]  ;;  %v854_v13 = vld [vmem:[%s1212_s12 + $0x20] sm:$0xff]   ;;  %v856_v15 = vld [vmem:[%s1212_s12 + $0x10] sm:$0xff]   ;;  %s545_s9 = sshll.u32 %s294_s14, 4  ;;  %s543_s0 = scalar_lea.hbm %s1281_s4, %s699_s7  ;;  %s546_s9 = int_to_ptr.vmem [resolvable:$true] %s545_s9 }
  0x59   : > { %v855_v14 = vld [vmem:[%s1212_s12 + $0x18] sm:$0xff]   ;;  %v857_v16 = vld [vmem:[%s1212_s12 + $0x8] sm:$0xff]   ;;  %v858_v17 = vld [vmem:[%s1212_s12] sm:$0xff]   ;;  %s297_s27 = scalar_lea.vmem %s1280_s3, %s296_s21  ;;  %s531_s2 = scalar_lea.sflag [#allocation4], %s1200_s6 }
  0x5a   : > { %v697_v28 = vld [vmem:[%s297_s27] ss:$0 sm:$0xff]  ;;  %s947_s30 = scalar_lea.vmem %s546_s9, 128  ;;  %s1044_s19 = smov [#allocation8]  }
  0x5b   : > { %724 = vmatpush3.bf16.msra.mxu0 %v844_v2  ;;  %p948_p4 = scmp.ne.s32.totalorder %s546_s9, %s947_s30  ;;  %s951_s8 = sshll.u32 %s1044_s19, 4  ;;  %s952_s8 = int_to_ptr.vmem [resolvable:$false] %s951_s8 }
  0x5c   : > { %725 = vmatprep.subr.bf16.mxu0 %v1042_v0  ;;  %s953_s18 = scalar_lea.vmem %s952_s8, 256  ;;  %p954_p7 = scmp.lt.s32.totalorder %s546_s9, %s952_s8 }
  0x5d   : > { %p949_p8 = pnand %p948_p4, %p1156_p0  ;;  %p955_p2 = scmp.lt.s32.totalorder %s953_s18, %s947_s30 }
  0x5f   : > { %726 = vmatpush3.bf16.msra.mxu0 %v845_v3  ;;  %744 = vmatpush3.bf16.xpose.msra.mxu1 %v852_v7  ;;  %p950_p5 = pneg %p949_p8  ;;  %p956_p6 = por %p955_p2, %p954_p7 }
  0x60   : > { %727 = vmatprep.subr.bf16.mxu0 %v1042_v0  ;;  %745 = vmatprep.subr.bf16.mxu1 %v1042_v0 }
  0x61   : > { %p957_p9 = pnand %p956_p6, %p950_p5 }
  0x63   : > { %728 = vmatpush3.bf16.msra.mxu0 %v846_v5 }
  0x64   : > { %729 = vmatprep.subr.bf16.mxu0 %v1042_v0 }
  0x67   : > { %730 = vmatpush3.bf16.msra.mxu0 %v847_v6  ;;  %746 = vmatpush3.bf16.xpose.msra.mxu1 %v853_v10 }
  0x68   : > { %731 = vmatprep.subr.bf16.mxu0 %v1042_v0  ;;  %747 = vmatprep.subr.bf16.mxu1 %v1042_v0 }
  0x6b   : > { %732 = vmatpush3.bf16.msra.mxu0 %v848_v8 }
  0x6c   : > { %733 = vmatprep.subr.bf16.mxu0 %v1042_v0 }
  0x6f   : > { %734 = vmatpush3.bf16.msra.mxu0 %v849_v9  ;;  %748 = vmatpush3.bf16.xpose.msra.mxu1 %v854_v13 }
  0x70   : > { %735 = vmatprep.subr.bf16.mxu0 %v1042_v0  ;;  %749 = vmatprep.subr.bf16.mxu1 %v1042_v0 }
  0x73   : > { %736 = vmatpush3.bf16.msra.mxu0 %v850_v11 }
  0x76   : > { %738 = vmatmul.mubr.bf16.vlgmr.msra.gmra.mxu0 %v299_v12 }
  0x77   : > { %750 = vmatpush3.bf16.xpose.msra.mxu1 %v855_v14 }
  0x78   : > { %751 = vmatprep.subr.bf16.mxu1 %v1042_v0 }
  0x7f   : > { %752 = vmatpush3.bf16.xpose.msra.mxu1 %v856_v15 }
  0x80   : > { %753 = vmatprep.subr.bf16.mxu1 %v1042_v0 }
  0x87   : > { %754 = vmatpush3.bf16.xpose.msra.mxu1 %v857_v16 }
  0x88   : > { %755 = vmatprep.subr.bf16.mxu1 %v1042_v0 }
  0x8f   : > { %756 = vmatpush3.bf16.xpose.msra.mxu1 %v858_v17 }
 0x136   : > { %v398_v18 = vpop.f32.mrf.mxu0 }
 0x137   : > { %v404_v19 = vpack.c.bf16 %v398_v18, %v398_v18 }
 0x138   : > { %v739_v20 = vpop.f32.mrf.mxu0 }
 0x139   : > { %758 = vmatmul.mubr.bf16.vlgmr.msra.gmra.mxu1 %v404_v19 }
 0x13a   : > { %v401_v21 = vpop.f32.mrf.mxu0 }
 0x13c   : > { %v740_v22 = vpop.f32.mrf.mxu0 }
 0x1f9   : > { %v503_v23 = vpop.f32.mrf.mxu1 }
 0x1fa   : > { %859 = vtanh.f32 %v503_v23 }
 0x1fb   : > { %v759_v24 = vpop.f32.mrf.mxu1 }
 0x1fd   : > { %v506_v25 = vpop.f32.mrf.mxu1 }
 0x1ff   : > { %v760_v26 = vpop.f32.mrf.mxu1 }
 0x207   : > { %v860_v27 = vpop.eup %859 }
 0x208   : > { %v510_v29 = vmul.f32 100.0, %v860_v27 }
 0x20a   : > { %v518_v30 = vadd.f32 %v697_v28, %v510_v29 }
 0x20c   : > { %519 = vmax.xlane.f32.xlu0 %v518_v30 }
 0x295   : > { %v520_v31 = vpop.xlane.xlu0 %519 }
 0x296   : > { %v521_v32 = vsub.f32 %v518_v30, %v520_v31 }
 0x298   : > { %v522_v33 = vmul.f32 1.442695, %v521_v32 }
 0x29a   : > { %861 = vpow2.f32 %v522_v33 }
 0x2a7   : > { %v862_v34 = vpop.eup %861 }
 0x2a8   : > { %524 = vadd.xlane.f32.xlu0 %v862_v34 }
 0x331   : > { %v525_v35 = vpop.xlane.xlu0 %524 }
 0x332   : > { %863 = vlog2.f32 %v525_v35 }
 0x33f   : > { %v864_v36 = vpop.eup %863 }
 0x340   : > { %v527_v37 = vmul.f32 0.6931472, %v864_v36 }
 0x342   : > { %v528_v38 = vsub.f32 %v521_v32, %v527_v37 }
 0x344   : > { %529 = vst [vmem:[%s294_s14] sm:$0xff] %v528_v38 }
 0x345   : > { %960 = shalt.err (!%p957_p9)
}
 0x346   : > { %s961_s25 = scalar_lea.hbm %s543_s0, 128  ;;  %s965_s5 = scalar_lea.hbm %s1281_s4, 256 }
 0x347   : > { %p962_p12 = scmp.ne.s32.totalorder %s543_s0, %s961_s25  ;;  %p966_p3 = scmp.lt.s32.totalorder %s543_s0, %s1281_s4 }
 0x348   : > { %p967_p1 = scmp.lt.s32.totalorder %s965_s5, %s961_s25 }
 0x349   : > { %p963_p13 = pnand %p962_p12, %p1156_p0 }
 0x34a   : > { %p968_p4 = por %p967_p1, %p966_p3 }
 0x34b   : > { %p964_p11 = pneg %p963_p13 }
 0x34d   : > { %p969_p8 = pnand %p968_p4, %p964_p11 }
 0x34f   : > { %972 = shalt.err (!%p969_p8)
}
 0x350   : > { %769 = dma.vmem_to_hbm [thread:$0]  (%p1156_p0), %s546_s9, 128, %s543_s0, %s531_s2  }
 0x351 PF: > { %s557_s23 = sand.u32 1, %s1015_s15   ;;  %p1302_p5 = scmp.ne.s32.totalorder %s1290_s24, 0 }
 0x352   : > { %s558_s13 = scalar_lea.sflag [#allocation4], %s557_s23 }
 0x353   : > { %p783_p7 = pnand %p670_p10, %p1302_p5 }
 0x355   : > { %p784_p2 = pneg %p783_p7 }
 0x357   : > { %1010 = dma.done.wait (%p784_p2), %s558_s13, 128  }
 0x358   : > { %1012 = vsyncadd (%p784_p2), %s558_s13, 4294967168  ;;  %s23_s20 = sadd.s32 1, %s1035_s20   ;;  %s1303_s18 = sld [smem:[#allocation13_spill]] }
 0x359   : > { %p20_p6 = scmp.ge.s32.totalorder %s23_s20, 4   ;;  %s1304_s19 = sld [smem:[#allocation14_spill]] }
 0x35a   : > { %s1305_s15 = smov %s1019_s16  ;;  %s1306_s16 = smov %s1023_s17 }
 0x35b   : > { %s1307_s17 = smov %s1165_s22  ;;  %22 = sbr.rel (!%p20_p6) target bundleno = 11 (0xb), region = 101 }
 0x360   :  { %563 = vsyncpa [#allocation3], 1 }
 0x361   :  { %565 = vsyncpa [#allocation3 + $0x1], 1 }
 0x362   :  { %566 = vsyncpa [#allocation6], 1 }
 0x363   :  { %568 = vsyncpa [#allocation6 + $0x1], 1 }
 0x364   :  { %569 = vsyncpa [#allocation4], 1 }
 0x365   :  { %571 = vsyncpa [#allocation4 + $0x1], 1 }

</bundles_post_ra>
